<compile_context>
chip_gen: v6e
topology: v6e:2x2x1
jax: 0.10.0
libtpu: 0.0.40
codegen_flags: <defaults>
</compile_context>

<pallas_src>
import functools

import jax
import jax.numpy as jnp
from jax.experimental import pallas as pl
from jax.experimental.pallas import tpu as pltpu


def _fused_residual_block_kernel(x_ref, w1_ref, b1_ref, w2_ref, b2_ref,
                                 mask_ref, o_ref, im2col_ref, *, H, W, bblk):
    """out = x + conv2(silu(conv1(silu(x)))) for `bblk` batch elements.

    x_ref:      (bblk, C, H*W) f32   input, flattened spatial on the lane axis
    w*_ref:     (C, 9*C)       bf16  im2col-packed conv weights (Cout, 9*Cin)
    b*_ref:     (C, 1)         f32   bias
    mask_ref:   (9, 1, H*W)    f32   0/1 border masks, one row per 3x3 tap
    o_ref:      (bblk, C, H*W) f32   output
    im2col_ref: (9*C, H*W)     f32   VMEM scratch for the stacked taps
    """
    HW = H * W
    C = x_ref.shape[1]
    offsets = [(oh, ow) for oh in (-1, 0, 1) for ow in (-1, 0, 1)]

    w1 = w1_ref[...]                               # (C, 9C) bf16 (pre-packed)
    w2 = w2_ref[...]
    b1 = b1_ref[...]                               # (C, 1) f32
    b2 = b2_ref[...]

    def silu(v):                                   # f32 math (EUP sigmoid)
        return v * jax.nn.sigmoid(v)

    def build_im2col(s):
        """Stage the 9 shifted+masked taps of s (C,HW f32) into im2col_ref."""
        # Row rolls computed once; corner taps are +/-1 lane rolls of these.
        rows = {
            -1: pltpu.roll(s, W, axis=1),          # reads (row-1, col)
            0: s,
            1: pltpu.roll(s, HW - W, axis=1),      # reads (row+1, col)
        }
        for t, (oh, ow) in enumerate(offsets):
            tap = rows[oh]
            if ow != 0:
                tap = pltpu.roll(tap, (-ow) % HW, axis=1)   # +/-1 lane roll
            if not (oh == 0 and ow == 0):
                # Zero lanes where (row+oh, col+ow) leaves the image (SAME pad).
                tap = tap * mask_ref[t]            # (C,HW) * (1,HW) f32
            im2col_ref[pl.ds(t * C, C), :] = tap
        # TODO(synk): on v6e/v7x the staging could be done in bf16 (cast s once
        # up front) to halve the scratch footprint; f32 kept for v5e's VPU.

    def conv3x3(s, w, b):
        build_im2col(s)
        # Single MXU matmul per conv: (Cout, 9*Cin) x (9*Cin, HW), f32 accum.
        acc = jax.lax.dot_general(
            w, im2col_ref[...].astype(jnp.bfloat16),
            dimension_numbers=(((1,), (0,)), ((), ())),
            preferred_element_type=jnp.float32)    # (C, HW), lane-dense
        return acc + b                             # (C,1) broadcasts on lanes

    for bi in range(bblk):
        h = conv3x3(silu(x_ref[bi]), w1, b1)       # conv1(silu(x))
        y = conv3x3(silu(h), w2, b2)               # conv2(silu(h))
        # Re-read x for the identity skip instead of holding it live.
        o_ref[bi] = (x_ref[bi] + y).astype(o_ref.dtype)


def residual_block_forward(x_nchw, params, *, batch_block=None):
    """ResidualBlock.forward for the CITRIS instantiation (Identity skip)."""
    B, C, H, W = x_nchw.shape
    HW = H * W
    if batch_block is None:
        # Keep the parallel grid axis >= 2 (both v7x TCs busy) at small batch;
        # amortize per-step pipeline overhead with bigger blocks at larger B.
        batch_block = 1 if B <= 2 else 2
    assert B % batch_block == 0, (B, batch_block)

    # Layout-preserving reshape -- no transpose / pad HBM passes.
    xf = x_nchw.reshape(B, C, HW)

    def pack_w(w_hwio):
        # HWIO (3,3,Cin,Cout) -> (Cout, 9*Cin) bf16; K order = tap-major, Cin-minor
        # (matches the im2col_ref row order t*Cin + ci).
        return jnp.transpose(w_hwio, (3, 0, 1, 2)).reshape(C, 9 * C).astype(jnp.bfloat16)

    w1 = pack_w(params["w1"])
    w2 = pack_w(params["w2"])
    b1 = params["b1"].reshape(C, 1).astype(jnp.float32)
    b2 = params["b2"].reshape(C, 1).astype(jnp.float32)

    # Precomputed 0/1 border masks (9, 1, HW): integer row/col decomposition.
    idx = jnp.arange(HW, dtype=jnp.int32)
    row = idx // W
    col = idx - row * W
    offs = [(oh, ow) for oh in (-1, 0, 1) for ow in (-1, 0, 1)]
    mask = jnp.stack([
        (row + oh >= 0) & (row + oh < H) & (col + ow >= 0) & (col + ow < W)
        for (oh, ow) in offs
    ]).astype(jnp.float32).reshape(9, 1, HW)

    kernel = functools.partial(_fused_residual_block_kernel,
                               H=H, W=W, bblk=batch_block)
    out = pl.pallas_call(
        kernel,
        out_shape=jax.ShapeDtypeStruct((B, C, HW), x_nchw.dtype),
        grid=(B // batch_block,),
        in_specs=[
            pl.BlockSpec((batch_block, C, HW), lambda b: (b, 0, 0)),
            pl.BlockSpec((C, 9 * C), lambda b: (0, 0)),
            pl.BlockSpec((C, 1), lambda b: (0, 0)),
            pl.BlockSpec((C, 9 * C), lambda b: (0, 0)),
            pl.BlockSpec((C, 1), lambda b: (0, 0)),
            pl.BlockSpec((9, 1, HW), lambda b: (0, 0, 0)),
        ],
        out_specs=pl.BlockSpec((batch_block, C, HW), lambda b: (b, 0, 0)),
        scratch_shapes=[pltpu.VMEM((9 * C, HW), jnp.float32)],
        compiler_params=pltpu.CompilerParams(
            dimension_semantics=("parallel",)),
    )(xf, w1, b1, w2, b2, mask)
    return out.reshape(B, C, H, W)


def _reference(x_nchw, params):
    """Pure-JAX reference (matches PyTorch semantics of the instantiated block)."""
    x = jnp.transpose(x_nchw, (0, 2, 3, 1))

    def conv(h, w, b):
        y = jax.lax.conv_general_dilated(
            h, w, window_strides=(1, 1), padding="SAME",
            dimension_numbers=("NHWC", "HWIO", "NHWC"))
        return y + b.reshape(1, 1, 1, -1)

    h = conv(jax.nn.silu(x), params["w1"], params["b1"])
    out = x + conv(jax.nn.silu(h), params["w2"], params["b2"])
    return jnp.transpose(out, (0, 3, 1, 2))


def init_params(key, c):
    """Deterministic synthetic parameter init (Conv2d(c, c, 3, padding=1) x 2)."""
    k1, k2, k3, k4 = jax.random.split(key, 4)
    fan_in = c * 3 * 3
    scale = 1.0 / jnp.sqrt(fan_in)
    return {
        "w1": jax.random.uniform(k1, (3, 3, c, c), jnp.float32, -scale, scale),
        "b1": jax.random.uniform(k2, (c,), jnp.float32, -scale, scale),
        "w2": jax.random.uniform(k3, (3, 3, c, c), jnp.float32, -scale, scale),
        "b2": jax.random.uniform(k4, (c,), jnp.float32, -scale, scale),
    }


if __name__ == "__main__":
    key = jax.random.PRNGKey(0)
    kx, kp = jax.random.split(key)

    B, C, H, W = 2, 4, 16, 16
    x = jax.random.normal(kx, (B, C, H, W), jnp.float32)   # NCHW like PyTorch
    params = init_params(kp, C)

    fwd = jax.jit(residual_block_forward)
    out = jax.block_until_ready(fwd(x, params))
    ref = jax.block_until_ready(_reference(x, params))

    assert out.shape == (B, C, H, W), out.shape
    # bf16 MXU operands (f32 accumulation) => looser tolerance than pure f32.
    assert jnp.allclose(out, ref, atol=5e-2, rtol=5e-2), \
        float(jnp.max(jnp.abs(out - ref)))
    print("KERNEL_OK")
</pallas_src>

<mosaic_0001>
module attributes {stable_mosaic.version = 11 : i64} {
  func.func @_fused_residual_block_kernel(%arg0: i32, %arg1: memref<1x4x256xf32, #tpu.memory_space<vmem>>, %arg2: memref<4x36xbf16, #tpu.memory_space<vmem>>, %arg3: memref<4x1xf32, #tpu.memory_space<vmem>>, %arg4: memref<4x36xbf16, #tpu.memory_space<vmem>>, %arg5: memref<4x1xf32, #tpu.memory_space<vmem>>, %arg6: memref<9x1x256xf32, #tpu.memory_space<vmem>>, %arg7: memref<1x4x256xf32, #tpu.memory_space<vmem>>, %arg8: memref<36x256xf32, #tpu.memory_space<vmem>>) attributes {dimension_semantics = [#tpu.dimension_semantics<parallel>], iteration_bounds = array<i64: 2>, scalar_prefetch = 0 : i64, scratch_operands = 1 : i64, tpu.core_type = #tpu.core_type<tc>, window_params = [{transform_indices = @transform_0, window_bounds = array<i64: 1, 4, 256>}, {pipeline_mode = #tpu.pipeline_mode<synchronous>, transform_indices = @transform_1, window_bounds = array<i64: 4, 36>}, {pipeline_mode = #tpu.pipeline_mode<synchronous>, transform_indices = @transform_2, window_bounds = array<i64: 4, 1>}, {pipeline_mode = #tpu.pipeline_mode<synchronous>, transform_indices = @transform_3, window_bounds = array<i64: 4, 36>}, {pipeline_mode = #tpu.pipeline_mode<synchronous>, transform_indices = @transform_4, window_bounds = array<i64: 4, 1>}, {pipeline_mode = #tpu.pipeline_mode<synchronous>, transform_indices = @transform_5, window_bounds = array<i64: 9, 1, 256>}, {transform_indices = @transform_6, window_bounds = array<i64: 1, 4, 256>}]} {
    %c0 = arith.constant 0 : index
    %c0_0 = arith.constant 0 : index
    %0 = vector.load %arg2[%c0, %c0_0] : memref<4x36xbf16, #tpu.memory_space<vmem>>, vector<4x36xbf16>
    %c0_1 = arith.constant 0 : index
    %c0_2 = arith.constant 0 : index
    %1 = vector.load %arg4[%c0_1, %c0_2] : memref<4x36xbf16, #tpu.memory_space<vmem>>, vector<4x36xbf16>
    %c0_3 = arith.constant 0 : index
    %c0_4 = arith.constant 0 : index
    %2 = vector.load %arg3[%c0_3, %c0_4] : memref<4x1xf32, #tpu.memory_space<vmem>>, vector<4x1xf32>
    %c0_5 = arith.constant 0 : index
    %c0_6 = arith.constant 0 : index
    %3 = vector.load %arg5[%c0_5, %c0_6] : memref<4x1xf32, #tpu.memory_space<vmem>>, vector<4x1xf32>
    %c0_7 = arith.constant 0 : index
    %c0_8 = arith.constant 0 : index
    %c0_9 = arith.constant 0 : index
    %4 = vector.load %arg1[%c0_7, %c0_8, %c0_9] : memref<1x4x256xf32, #tpu.memory_space<vmem>>, vector<1x4x256xf32>
    %5 = vector.shape_cast %4 : vector<1x4x256xf32> to vector<4x256xf32>
    %6 = arith.negf %5 : vector<4x256xf32>
    %7 = math.exp %6 : vector<4x256xf32>
    %cst = arith.constant 1.000000e+00 : f32
    %8 = vector.broadcast %cst : f32 to vector<4x256xf32>
    %9 = arith.addf %8, %7 : vector<4x256xf32>
    %10 = arith.divf %8, %9 : vector<4x256xf32>
    %11 = arith.mulf %5, %10 : vector<4x256xf32>
    %c16_i32 = arith.constant 16 : i32
    %12 = tpu.dynamic_rotate %11 by %c16_i32 dim 1 : vector<4x256xf32>, i32 -> vector<4x256xf32>
    %c240_i32 = arith.constant 240 : i32
    %13 = tpu.dynamic_rotate %11 by %c240_i32 dim 1 : vector<4x256xf32>, i32 -> vector<4x256xf32>
    %c1_i32 = arith.constant 1 : i32
    %14 = tpu.dynamic_rotate %12 by %c1_i32 dim 1 : vector<4x256xf32>, i32 -> vector<4x256xf32>
    %c0_10 = arith.constant 0 : index
    %c0_11 = arith.constant 0 : index
    %c0_12 = arith.constant 0 : index
    %15 = vector.load %arg6[%c0_10, %c0_11, %c0_12] : memref<9x1x256xf32, #tpu.memory_space<vmem>>, vector<1x1x256xf32>
    %16 = vector.shape_cast %15 : vector<1x1x256xf32> to vector<1x256xf32>
    %17 = vector.broadcast %16 : vector<1x256xf32> to vector<4x256xf32>
    %18 = arith.mulf %14, %17 : vector<4x256xf32>
    %c0_13 = arith.constant 0 : index
    %c0_14 = arith.constant 0 : index
    %19 = vector.load %arg8[%c0_13, %c0_14] : memref<36x256xf32, #tpu.memory_space<vmem>>, vector<4x256xf32>
    tpu.vector_store %arg8[%c0_13, %c0_14], %18 {strides = array<i32>} : memref<36x256xf32, #tpu.memory_space<vmem>>, vector<4x256xf32>,
    %c1 = arith.constant 1 : index
    %c0_15 = arith.constant 0 : index
    %c0_16 = arith.constant 0 : index
    %20 = vector.load %arg6[%c1, %c0_15, %c0_16] : memref<9x1x256xf32, #tpu.memory_space<vmem>>, vector<1x1x256xf32>
    %21 = vector.shape_cast %20 : vector<1x1x256xf32> to vector<1x256xf32>
    %22 = vector.broadcast %21 : vector<1x256xf32> to vector<4x256xf32>
    %23 = arith.mulf %12, %22 : vector<4x256xf32>
    %c4 = arith.constant 4 : index
    %c0_17 = arith.constant 0 : index
    %24 = vector.load %arg8[%c4, %c0_17] : memref<36x256xf32, #tpu.memory_space<vmem>>, vector<4x256xf32>
    tpu.vector_store %arg8[%c4, %c0_17], %23 {strides = array<i32>} : memref<36x256xf32, #tpu.memory_space<vmem>>, vector<4x256xf32>,
    %c255_i32 = arith.constant 255 : i32
    %25 = tpu.dynamic_rotate %12 by %c255_i32 dim 1 : vector<4x256xf32>, i32 -> vector<4x256xf32>
    %c2 = arith.constant 2 : index
    %c0_18 = arith.constant 0 : index
    %c0_19 = arith.constant 0 : index
    %26 = vector.load %arg6[%c2, %c0_18, %c0_19] : memref<9x1x256xf32, #tpu.memory_space<vmem>>, vector<1x1x256xf32>
    %27 = vector.shape_cast %26 : vector<1x1x256xf32> to vector<1x256xf32>
    %28 = vector.broadcast %27 : vector<1x256xf32> to vector<4x256xf32>
    %29 = arith.mulf %25, %28 : vector<4x256xf32>
    %c8 = arith.constant 8 : index
    %c0_20 = arith.constant 0 : index
    %30 = vector.load %arg8[%c8, %c0_20] : memref<36x256xf32, #tpu.memory_space<vmem>>, vector<4x256xf32>
    tpu.vector_store %arg8[%c8, %c0_20], %29 {strides = array<i32>} : memref<36x256xf32, #tpu.memory_space<vmem>>, vector<4x256xf32>,
    %c1_i32_21 = arith.constant 1 : i32
    %31 = tpu.dynamic_rotate %11 by %c1_i32_21 dim 1 : vector<4x256xf32>, i32 -> vector<4x256xf32>
    %c3 = arith.constant 3 : index
    %c0_22 = arith.constant 0 : index
    %c0_23 = arith.constant 0 : index
    %32 = vector.load %arg6[%c3, %c0_22, %c0_23] : memref<9x1x256xf32, #tpu.memory_space<vmem>>, vector<1x1x256xf32>
    %33 = vector.shape_cast %32 : vector<1x1x256xf32> to vector<1x256xf32>
    %34 = vector.broadcast %33 : vector<1x256xf32> to vector<4x256xf32>
    %35 = arith.mulf %31, %34 : vector<4x256xf32>
    %c12 = arith.constant 12 : index
    %c0_24 = arith.constant 0 : index
    %36 = vector.load %arg8[%c12, %c0_24] : memref<36x256xf32, #tpu.memory_space<vmem>>, vector<4x256xf32>
    tpu.vector_store %arg8[%c12, %c0_24], %35 {strides = array<i32>} : memref<36x256xf32, #tpu.memory_space<vmem>>, vector<4x256xf32>,
    %c16 = arith.constant 16 : index
    %c0_25 = arith.constant 0 : index
    %37 = vector.load %arg8[%c16, %c0_25] : memref<36x256xf32, #tpu.memory_space<vmem>>, vector<4x256xf32>
    tpu.vector_store %arg8[%c16, %c0_25], %11 {strides = array<i32>} : memref<36x256xf32, #tpu.memory_space<vmem>>, vector<4x256xf32>,
    %c255_i32_26 = arith.constant 255 : i32
    %38 = tpu.dynamic_rotate %11 by %c255_i32_26 dim 1 : vector<4x256xf32>, i32 -> vector<4x256xf32>
    %c5 = arith.constant 5 : index
    %c0_27 = arith.constant 0 : index
    %c0_28 = arith.constant 0 : index
    %39 = vector.load %arg6[%c5, %c0_27, %c0_28] : memref<9x1x256xf32, #tpu.memory_space<vmem>>, vector<1x1x256xf32>
    %40 = vector.shape_cast %39 : vector<1x1x256xf32> to vector<1x256xf32>
    %41 = vector.broadcast %40 : vector<1x256xf32> to vector<4x256xf32>
    %42 = arith.mulf %38, %41 : vector<4x256xf32>
    %c20 = arith.constant 20 : index
    %c0_29 = arith.constant 0 : index
    %43 = vector.load %arg8[%c20, %c0_29] : memref<36x256xf32, #tpu.memory_space<vmem>>, vector<4x256xf32>
    tpu.vector_store %arg8[%c20, %c0_29], %42 {strides = array<i32>} : memref<36x256xf32, #tpu.memory_space<vmem>>, vector<4x256xf32>,
    %c1_i32_30 = arith.constant 1 : i32
    %44 = tpu.dynamic_rotate %13 by %c1_i32_30 dim 1 : vector<4x256xf32>, i32 -> vector<4x256xf32>
    %c6 = arith.constant 6 : index
    %c0_31 = arith.constant 0 : index
    %c0_32 = arith.constant 0 : index
    %45 = vector.load %arg6[%c6, %c0_31, %c0_32] : memref<9x1x256xf32, #tpu.memory_space<vmem>>, vector<1x1x256xf32>
    %46 = vector.shape_cast %45 : vector<1x1x256xf32> to vector<1x256xf32>
    %47 = vector.broadcast %46 : vector<1x256xf32> to vector<4x256xf32>
    %48 = arith.mulf %44, %47 : vector<4x256xf32>
    %c24 = arith.constant 24 : index
    %c0_33 = arith.constant 0 : index
    %49 = vector.load %arg8[%c24, %c0_33] : memref<36x256xf32, #tpu.memory_space<vmem>>, vector<4x256xf32>
    tpu.vector_store %arg8[%c24, %c0_33], %48 {strides = array<i32>} : memref<36x256xf32, #tpu.memory_space<vmem>>, vector<4x256xf32>,
    %c7 = arith.constant 7 : index
    %c0_34 = arith.constant 0 : index
    %c0_35 = arith.constant 0 : index
    %50 = vector.load %arg6[%c7, %c0_34, %c0_35] : memref<9x1x256xf32, #tpu.memory_space<vmem>>, vector<1x1x256xf32>
    %51 = vector.shape_cast %50 : vector<1x1x256xf32> to vector<1x256xf32>
    %52 = vector.broadcast %51 : vector<1x256xf32> to vector<4x256xf32>
    %53 = arith.mulf %13, %52 : vector<4x256xf32>
    %c28 = arith.constant 28 : index
    %c0_36 = arith.constant 0 : index
    %54 = vector.load %arg8[%c28, %c0_36] : memref<36x256xf32, #tpu.memory_space<vmem>>, vector<4x256xf32>
    tpu.vector_store %arg8[%c28, %c0_36], %53 {strides = array<i32>} : memref<36x256xf32, #tpu.memory_space<vmem>>, vector<4x256xf32>,
    %c255_i32_37 = arith.constant 255 : i32
    %55 = tpu.dynamic_rotate %13 by %c255_i32_37 dim 1 : vector<4x256xf32>, i32 -> vector<4x256xf32>
    %c8_38 = arith.constant 8 : index
    %c0_39 = arith.constant 0 : index
    %c0_40 = arith.constant 0 : index
    %56 = vector.load %arg6[%c8_38, %c0_39, %c0_40] : memref<9x1x256xf32, #tpu.memory_space<vmem>>, vector<1x1x256xf32>
    %57 = vector.shape_cast %56 : vector<1x1x256xf32> to vector<1x256xf32>
    %58 = vector.broadcast %57 : vector<1x256xf32> to vector<4x256xf32>
    %59 = arith.mulf %55, %58 : vector<4x256xf32>
    %c32 = arith.constant 32 : index
    %c0_41 = arith.constant 0 : index
    %60 = vector.load %arg8[%c32, %c0_41] : memref<36x256xf32, #tpu.memory_space<vmem>>, vector<4x256xf32>
    tpu.vector_store %arg8[%c32, %c0_41], %59 {strides = array<i32>} : memref<36x256xf32, #tpu.memory_space<vmem>>, vector<4x256xf32>,
    %c0_42 = arith.constant 0 : index
    %c0_43 = arith.constant 0 : index
    %61 = vector.load %arg8[%c0_42, %c0_43] : memref<36x256xf32, #tpu.memory_space<vmem>>, vector<36x256xf32>
    %62 = arith.truncf %61 : vector<36x256xf32> to vector<36x256xbf16>
    %cst_44 = arith.constant dense<0.000000e+00> : vector<4x256xf32>
    %63 = tpu.matmul %0, %62, %cst_44 {dimension_numbers = #tpu.dot_dimension_numbers<[1], [0], [0], [1], [0, 0, 1, 1], [], []>} : vector<4x36xbf16>, vector<36x256xbf16>, vector<4x256xf32> -> vector<4x256xf32>
    %64 = vector.broadcast %2 : vector<4x1xf32> to vector<4x256xf32>
    %65 = arith.addf %63, %64 : vector<4x256xf32>
    %66 = arith.negf %65 : vector<4x256xf32>
    %67 = math.exp %66 : vector<4x256xf32>
    %cst_45 = arith.constant 1.000000e+00 : f32
    %68 = vector.broadcast %cst_45 : f32 to vector<4x256xf32>
    %69 = arith.addf %68, %67 : vector<4x256xf32>
    %70 = arith.divf %68, %69 : vector<4x256xf32>
    %71 = arith.mulf %65, %70 : vector<4x256xf32>
    %c16_i32_46 = arith.constant 16 : i32
    %72 = tpu.dynamic_rotate %71 by %c16_i32_46 dim 1 : vector<4x256xf32>, i32 -> vector<4x256xf32>
    %c240_i32_47 = arith.constant 240 : i32
    %73 = tpu.dynamic_rotate %71 by %c240_i32_47 dim 1 : vector<4x256xf32>, i32 -> vector<4x256xf32>
    %c1_i32_48 = arith.constant 1 : i32
    %74 = tpu.dynamic_rotate %72 by %c1_i32_48 dim 1 : vector<4x256xf32>, i32 -> vector<4x256xf32>
    %c0_49 = arith.constant 0 : index
    %c0_50 = arith.constant 0 : index
    %c0_51 = arith.constant 0 : index
    %75 = vector.load %arg6[%c0_49, %c0_50, %c0_51] : memref<9x1x256xf32, #tpu.memory_space<vmem>>, vector<1x1x256xf32>
    %76 = vector.shape_cast %75 : vector<1x1x256xf32> to vector<1x256xf32>
    %77 = vector.broadcast %76 : vector<1x256xf32> to vector<4x256xf32>
    %78 = arith.mulf %74, %77 : vector<4x256xf32>
    %c0_52 = arith.constant 0 : index
    %c0_53 = arith.constant 0 : index
    %79 = vector.load %arg8[%c0_52, %c0_53] : memref<36x256xf32, #tpu.memory_space<vmem>>, vector<4x256xf32>
    tpu.vector_store %arg8[%c0_52, %c0_53], %78 {strides = array<i32>} : memref<36x256xf32, #tpu.memory_space<vmem>>, vector<4x256xf32>,
    %c1_54 = arith.constant 1 : index
    %c0_55 = arith.constant 0 : index
    %c0_56 = arith.constant 0 : index
    %80 = vector.load %arg6[%c1_54, %c0_55, %c0_56] : memref<9x1x256xf32, #tpu.memory_space<vmem>>, vector<1x1x256xf32>
    %81 = vector.shape_cast %80 : vector<1x1x256xf32> to vector<1x256xf32>
    %82 = vector.broadcast %81 : vector<1x256xf32> to vector<4x256xf32>
    %83 = arith.mulf %72, %82 : vector<4x256xf32>
    %c4_57 = arith.constant 4 : index
    %c0_58 = arith.constant 0 : index
    %84 = vector.load %arg8[%c4_57, %c0_58] : memref<36x256xf32, #tpu.memory_space<vmem>>, vector<4x256xf32>
    tpu.vector_store %arg8[%c4_57, %c0_58], %83 {strides = array<i32>} : memref<36x256xf32, #tpu.memory_space<vmem>>, vector<4x256xf32>,
    %c255_i32_59 = arith.constant 255 : i32
    %85 = tpu.dynamic_rotate %72 by %c255_i32_59 dim 1 : vector<4x256xf32>, i32 -> vector<4x256xf32>
    %c2_60 = arith.constant 2 : index
    %c0_61 = arith.constant 0 : index
    %c0_62 = arith.constant 0 : index
    %86 = vector.load %arg6[%c2_60, %c0_61, %c0_62] : memref<9x1x256xf32, #tpu.memory_space<vmem>>, vector<1x1x256xf32>
    %87 = vector.shape_cast %86 : vector<1x1x256xf32> to vector<1x256xf32>
    %88 = vector.broadcast %87 : vector<1x256xf32> to vector<4x256xf32>
    %89 = arith.mulf %85, %88 : vector<4x256xf32>
    %c8_63 = arith.constant 8 : index
    %c0_64 = arith.constant 0 : index
    %90 = vector.load %arg8[%c8_63, %c0_64] : memref<36x256xf32, #tpu.memory_space<vmem>>, vector<4x256xf32>
    tpu.vector_store %arg8[%c8_63, %c0_64], %89 {strides = array<i32>} : memref<36x256xf32, #tpu.memory_space<vmem>>, vector<4x256xf32>,
    %c1_i32_65 = arith.constant 1 : i32
    %91 = tpu.dynamic_rotate %71 by %c1_i32_65 dim 1 : vector<4x256xf32>, i32 -> vector<4x256xf32>
    %c3_66 = arith.constant 3 : index
    %c0_67 = arith.constant 0 : index
    %c0_68 = arith.constant 0 : index
    %92 = vector.load %arg6[%c3_66, %c0_67, %c0_68] : memref<9x1x256xf32, #tpu.memory_space<vmem>>, vector<1x1x256xf32>
    %93 = vector.shape_cast %92 : vector<1x1x256xf32> to vector<1x256xf32>
    %94 = vector.broadcast %93 : vector<1x256xf32> to vector<4x256xf32>
    %95 = arith.mulf %91, %94 : vector<4x256xf32>
    %c12_69 = arith.constant 12 : index
    %c0_70 = arith.constant 0 : index
    %96 = vector.load %arg8[%c12_69, %c0_70] : memref<36x256xf32, #tpu.memory_space<vmem>>, vector<4x256xf32>
    tpu.vector_store %arg8[%c12_69, %c0_70], %95 {strides = array<i32>} : memref<36x256xf32, #tpu.memory_space<vmem>>, vector<4x256xf32>,
    %c16_71 = arith.constant 16 : index
    %c0_72 = arith.constant 0 : index
    %97 = vector.load %arg8[%c16_71, %c0_72] : memref<36x256xf32, #tpu.memory_space<vmem>>, vector<4x256xf32>
    tpu.vector_store %arg8[%c16_71, %c0_72], %71 {strides = array<i32>} : memref<36x256xf32, #tpu.memory_space<vmem>>, vector<4x256xf32>,
    %c255_i32_73 = arith.constant 255 : i32
    %98 = tpu.dynamic_rotate %71 by %c255_i32_73 dim 1 : vector<4x256xf32>, i32 -> vector<4x256xf32>
    %c5_74 = arith.constant 5 : index
    %c0_75 = arith.constant 0 : index
    %c0_76 = arith.constant 0 : index
    %99 = vector.load %arg6[%c5_74, %c0_75, %c0_76] : memref<9x1x256xf32, #tpu.memory_space<vmem>>, vector<1x1x256xf32>
    %100 = vector.shape_cast %99 : vector<1x1x256xf32> to vector<1x256xf32>
    %101 = vector.broadcast %100 : vector<1x256xf32> to vector<4x256xf32>
    %102 = arith.mulf %98, %101 : vector<4x256xf32>
    %c20_77 = arith.constant 20 : index
    %c0_78 = arith.constant 0 : index
    %103 = vector.load %arg8[%c20_77, %c0_78] : memref<36x256xf32, #tpu.memory_space<vmem>>, vector<4x256xf32>
    tpu.vector_store %arg8[%c20_77, %c0_78], %102 {strides = array<i32>} : memref<36x256xf32, #tpu.memory_space<vmem>>, vector<4x256xf32>,
    %c1_i32_79 = arith.constant 1 : i32
    %104 = tpu.dynamic_rotate %73 by %c1_i32_79 dim 1 : vector<4x256xf32>, i32 -> vector<4x256xf32>
    %c6_80 = arith.constant 6 : index
    %c0_81 = arith.constant 0 : index
    %c0_82 = arith.constant 0 : index
    %105 = vector.load %arg6[%c6_80, %c0_81, %c0_82] : memref<9x1x256xf32, #tpu.memory_space<vmem>>, vector<1x1x256xf32>
    %106 = vector.shape_cast %105 : vector<1x1x256xf32> to vector<1x256xf32>
    %107 = vector.broadcast %106 : vector<1x256xf32> to vector<4x256xf32>
    %108 = arith.mulf %104, %107 : vector<4x256xf32>
    %c24_83 = arith.constant 24 : index
    %c0_84 = arith.constant 0 : index
    %109 = vector.load %arg8[%c24_83, %c0_84] : memref<36x256xf32, #tpu.memory_space<vmem>>, vector<4x256xf32>
    tpu.vector_store %arg8[%c24_83, %c0_84], %108 {strides = array<i32>} : memref<36x256xf32, #tpu.memory_space<vmem>>, vector<4x256xf32>,
    %c7_85 = arith.constant 7 : index
    %c0_86 = arith.constant 0 : index
    %c0_87 = arith.constant 0 : index
    %110 = vector.load %arg6[%c7_85, %c0_86, %c0_87] : memref<9x1x256xf32, #tpu.memory_space<vmem>>, vector<1x1x256xf32>
    %111 = vector.shape_cast %110 : vector<1x1x256xf32> to vector<1x256xf32>
    %112 = vector.broadcast %111 : vector<1x256xf32> to vector<4x256xf32>
    %113 = arith.mulf %73, %112 : vector<4x256xf32>
    %c28_88 = arith.constant 28 : index
    %c0_89 = arith.constant 0 : index
    %114 = vector.load %arg8[%c28_88, %c0_89] : memref<36x256xf32, #tpu.memory_space<vmem>>, vector<4x256xf32>
    tpu.vector_store %arg8[%c28_88, %c0_89], %113 {strides = array<i32>} : memref<36x256xf32, #tpu.memory_space<vmem>>, vector<4x256xf32>,
    %c255_i32_90 = arith.constant 255 : i32
    %115 = tpu.dynamic_rotate %73 by %c255_i32_90 dim 1 : vector<4x256xf32>, i32 -> vector<4x256xf32>
    %c8_91 = arith.constant 8 : index
    %c0_92 = arith.constant 0 : index
    %c0_93 = arith.constant 0 : index
    %116 = vector.load %arg6[%c8_91, %c0_92, %c0_93] : memref<9x1x256xf32, #tpu.memory_space<vmem>>, vector<1x1x256xf32>
    %117 = vector.shape_cast %116 : vector<1x1x256xf32> to vector<1x256xf32>
    %118 = vector.broadcast %117 : vector<1x256xf32> to vector<4x256xf32>
    %119 = arith.mulf %115, %118 : vector<4x256xf32>
    %c32_94 = arith.constant 32 : index
    %c0_95 = arith.constant 0 : index
    %120 = vector.load %arg8[%c32_94, %c0_95] : memref<36x256xf32, #tpu.memory_space<vmem>>, vector<4x256xf32>
    tpu.vector_store %arg8[%c32_94, %c0_95], %119 {strides = array<i32>} : memref<36x256xf32, #tpu.memory_space<vmem>>, vector<4x256xf32>,
    %c0_96 = arith.constant 0 : index
    %c0_97 = arith.constant 0 : index
    %121 = vector.load %arg8[%c0_96, %c0_97] : memref<36x256xf32, #tpu.memory_space<vmem>>, vector<36x256xf32>
    %122 = arith.truncf %121 : vector<36x256xf32> to vector<36x256xbf16>
    %cst_98 = arith.constant dense<0.000000e+00> : vector<4x256xf32>
    %123 = tpu.matmul %1, %122, %cst_98 {dimension_numbers = #tpu.dot_dimension_numbers<[1], [0], [0], [1], [0, 0, 1, 1], [], []>} : vector<4x36xbf16>, vector<36x256xbf16>, vector<4x256xf32> -> vector<4x256xf32>
    %124 = vector.broadcast %3 : vector<4x1xf32> to vector<4x256xf32>
    %125 = arith.addf %123, %124 : vector<4x256xf32>
    %c0_99 = arith.constant 0 : index
    %c0_100 = arith.constant 0 : index
    %c0_101 = arith.constant 0 : index
    %126 = vector.load %arg1[%c0_99, %c0_100, %c0_101] : memref<1x4x256xf32, #tpu.memory_space<vmem>>, vector<1x4x256xf32>
    %127 = vector.shape_cast %126 : vector<1x4x256xf32> to vector<4x256xf32>
    %128 = arith.addf %127, %125 : vector<4x256xf32>
    %c0_102 = arith.constant 0 : index
    %c0_103 = arith.constant 0 : index
    %c0_104 = arith.constant 0 : index
    %129 = vector.load %arg7[%c0_102, %c0_103, %c0_104] : memref<1x4x256xf32, #tpu.memory_space<vmem>>, vector<1x4x256xf32>
    %130 = vector.shape_cast %129 : vector<1x4x256xf32> to vector<4x256xf32>
    %131 = vector.shape_cast %128 : vector<4x256xf32> to vector<1x4x256xf32>
    tpu.vector_store %arg7[%c0_102, %c0_103, %c0_104], %131 {strides = array<i32>} : memref<1x4x256xf32, #tpu.memory_space<vmem>>, vector<1x4x256xf32>,
    return
  }
  func.func @transform_0(%arg0: i32) -> (i32, i32, i32) {
    %c0_i32 = arith.constant 0 : i32
    %c0_i32_0 = arith.constant 0 : i32
    %c0_i32_1 = arith.constant 0 : i32
    return %arg0, %c0_i32, %c0_i32_0 : i32, i32, i32
  }
  func.func @transform_1(%arg0: i32) -> (i32, i32) {
    %c0_i32 = arith.constant 0 : i32
    %c0_i32_0 = arith.constant 0 : i32
    %c0_i32_1 = arith.constant 0 : i32
    return %c0_i32, %c0_i32_0 : i32, i32
  }
  func.func @transform_2(%arg0: i32) -> (i32, i32) {
    %c0_i32 = arith.constant 0 : i32
    %c0_i32_0 = arith.constant 0 : i32
    %c0_i32_1 = arith.constant 0 : i32
    return %c0_i32, %c0_i32_0 : i32, i32
  }
  func.func @transform_3(%arg0: i32) -> (i32, i32) {
    %c0_i32 = arith.constant 0 : i32
    %c0_i32_0 = arith.constant 0 : i32
    %c0_i32_1 = arith.constant 0 : i32
    return %c0_i32, %c0_i32_0 : i32, i32
  }
  func.func @transform_4(%arg0: i32) -> (i32, i32) {
    %c0_i32 = arith.constant 0 : i32
    %c0_i32_0 = arith.constant 0 : i32
    %c0_i32_1 = arith.constant 0 : i32
    return %c0_i32, %c0_i32_0 : i32, i32
  }
  func.func @transform_5(%arg0: i32) -> (i32, i32, i32) {
    %c0_i32 = arith.constant 0 : i32
    %c0_i32_0 = arith.constant 0 : i32
    %c0_i32_1 = arith.constant 0 : i32
    %c0_i32_2 = arith.constant 0 : i32
    return %c0_i32, %c0_i32_0, %c0_i32_1 : i32, i32, i32
  }
  func.func @transform_6(%arg0: i32) -> (i32, i32, i32) {
    %c0_i32 = arith.constant 0 : i32
    %c0_i32_0 = arith.constant 0 : i32
    %c0_i32_1 = arith.constant 0 : i32
    return %arg0, %c0_i32, %c0_i32_0 : i32, i32, i32
  }
}

</mosaic_0001>

<bundles_post_ra>
// kernel: residual_block_forward.1
= control target key start
LH: loop header
LB: loop body
LE: loop exit
PB: predicated region body
PF: predicated region fallthrough
CT: control target
= control target key end

     0   :  { %s1013_s21 = smov 0   ;;  %s1246_s0 = inlined_call_operand.vmem [shape: f32[2,4,256], index: 0, kind: input, shape index: {}]   ;;  %s1247_s1 = inlined_call_operand.vmem [shape: bf16[4,36], index: 1, kind: input, shape index: {}]   ;;  %s1248_s2 = inlined_call_operand.vmem [shape: f32[4,1], index: 2, kind: input, shape index: {}]   ;;  %s1249_s3 = inlined_call_operand.vmem [shape: bf16[4,36], index: 3, kind: input, shape index: {}]   ;;  %s1250_s4 = inlined_call_operand.vmem [shape: f32[4,1], index: 4, kind: input, shape index: {}]   ;;  %s1251_s5 = inlined_call_operand.vmem [shape: f32[9,1,256], index: 5, kind: input, shape index: {}]   ;;  %s1252_s6 = inlined_call_operand.vmem [shape: f32[2,4,256], index: 6, kind: output, shape index: {}]  }
   0x1 LB: > { %s905_s22 = sadd.s32 4294967295, %s971_s21   ;;  %p909_p0 = scmp.ge.s32.totalorder %s971_s21, 1  ;;  %s971_s21 = sphi %s1013_s21, %s16_s21  }
   0x2   : > { %p212_p1 = scmp.lt.s32.totalorder %s971_s21, 3 }
   0x4   : > { %p213_p2 = pnand %p909_p0, %p212_p1 }
   0x5   : > { %p242_p3 = scmp.lt.s32.totalorder (!%p213_p2), %s905_s22, 1  ;;  %s973_s27 = smov (!%p213_p2), 112  }
   0x6   : > { %216 = sbr.rel (%p213_p2) target bundleno = 1008 (0x3f0), region = 44  ;;  %s974_s28 = smov (!%p213_p2), 16  }
   0x7   : > { %s975_s29 = smov (!%p213_p2), 127   ;;  %s976_s30 = smov (!%p213_p2), 1  }
   0xb   : > { %s1254_s22 = smov (!%p242_p3, %s905_s22), 1  ;;  %v272_v7 = vlaneseq  ;;  %v920_v12 = vld [vmem:[%s1251_s5 + $0xe] sm:$0x3]  ;;  %v915_v13 = vld [vmem:[%s1251_s5 + $0x2] sm:$0x3]  ;;  %v977_v56 = vmov 0  }
   0xc   : > { %s937_s23 = sshll.u32 %s1254_s22, 3  ;;  %v918_v16 = vld [vmem:[%s1251_s5 + $0xa] sm:$0x3]  ;;  %v917_v32 = vld [vmem:[%s1251_s5 + $0x6] sm:$0x3]  ;;  %547 = vmatprep.mubr.bf16.mxu0 %v977_v56  ;;  %952 = vset.pattern.permute.xlu0 %v977_v56  ;;  %vm508_vm4 = vcmask 1041408  }
   0xd   : > { %s246_s26 = scalar_lea.vmem %s1246_s0, %s937_s23  ;;  %v294_v8 = vshrl.u32 %v272_v7, 7  ;;  %v1041_v9 = vand.u32 127, %v272_v7  ;;  %834 = vmatprep.mubr.bf16.mxu1 %v977_v56  ;;  %v255_v57 = vld [vmem:[%s1248_s2] sm:$0xf]  ;;  %v921_v58 = vld [vmem:[%s1251_s5 + $0x10] sm:$0x3]  ;;  %s251_s11 = scalar_lea.vmem %s1252_s6, %s937_s23 }
   0xe   : > { %v1029_v0 = vld [vmem:[%s246_s26] sm:$0xff]  ;;  %v919_v61 = vld [vmem:[%s1251_s5 + $0xc] sm:$0x3]  ;;  %vm504_vm5 = vcmask 293888  }
   0xf   : > { %v914_v1 = vmul.f32 -1.442695, %v1029_v0  ;;  %v1043_v10 = vsub.s32 0, %v294_v8  ;;  %v1045_v11 = vsub.s32 1, %v294_v8  ;;  %vm281_vm0 = vcmp.lt.s32.totalorder %v1041_v9, 112 }
  0x10   : > { %vm274_vm1 = vcmp.lt.s32.totalorder %v1041_v9, 16  ;;  %vm334_vm2 = vcmp.lt.s32.totalorder %v1041_v9, 127  ;;  %vm288_vm3 = vcmp.lt.s32.totalorder %v1041_v9, 1  ;;  %v291_v7 = vld [vmem:[%s1251_s5] sm:$0x3] }
  0x11   : > { %953 = vpow2.f32 %v914_v1  ;;  %v447_v17 = vrot.slane %v920_v12, %v1045_v11  ;;  %v443_v18 = vrot.slane %v920_v12, %v1043_v10  ;;  %v317_v19 = vrot.slane %v915_v13, %v1045_v11 }
  0x12   : > { %v313_v20 = vrot.slane %v915_v13, %v1043_v10  ;;  %v397_v23 = vrot.slane %v918_v16, %v1043_v10  ;;  %v401_v24 = vrot.slane %v918_v16, %v1045_v11  ;;  %v366_v42 = vrot.slane %v917_v32, %v1043_v10 }
  0x13   : > { %v370_v45 = vrot.slane %v917_v32, %v1045_v11  ;;  %v472_v59 = vrot.slane %v921_v58, %v1043_v10  ;;  %v476_v60 = vrot.slane %v921_v58, %v1045_v11 }
  0x1e   : > { %v954_v2 = vpop.eup %953 }
  0x1f   : > { %v261_v3 = vadd.f32 1.0, %v954_v2 }
  0x21   : > { %955 = vrcp.f32 %v261_v3 }
  0x2e   : > { %v956_v4 = vpop.eup %955 }
  0x2f   : > { %v264_v5 = vmul.f32 %v956_v4, %v1029_v0 }
  0x31   : > { %277 = vrot.lane.b32.xlu0 %v264_v5, %s973_s27  ;;  %383 = vst [vmem:[#allocation2 + $0x48] sm:$0xf] %v264_v5  ;;  %268 = vrot.lane.b32.xlu1 %v264_v5, %s974_s28  ;;  %v266_v6 = vcombine.high %v264_v5, %v264_v5 }
  0x33   : > { %384 = vst [vmem:[#allocation2 + $0x28] sm:$0xf] %v266_v6 }
  0x35   : > { %279 = vrot.lane.b32.xlu0 %v266_v6, %s973_s27  ;;  %270 = vrot.lane.b32.xlu1 %v266_v6, %s974_s28 }
  0x39   : > { %387 = vrot.lane.b32.xlu1 %v266_v6, %s975_s29  ;;  %385 = vrot.lane.b32.xlu0 %v264_v5, %s975_s29 }
  0x3d   : > { %356 = vrot.lane.b32.xlu1 %v266_v6, %s976_s30  ;;  %354 = vrot.lane.b32.xlu0 %v264_v5, %s976_s30  ;;  %v426_v5 = vrot.slane %v919_v61, %v1043_v10  ;;  %v430_v6 = vrot.slane %v919_v61, %v1045_v11 }
  0xa3   : > { %v278_v14 = vpop.permute.xlu0 %277  ;;  %v269_v15 = vpop.permute.xlu1 %268 }
  0xa7   : > { %v280_v21 = vpop.permute.xlu0 %279  ;;  %v271_v22 = vpop.permute.xlu1 %270 }
  0xa8   : > { %v283_v25 = vsel %vm281_vm0, %v280_v21, %v278_v14  ;;  %v282_v26 = vsel %vm281_vm0, %v278_v14, %v280_v21  ;;  %v275_v27 = vsel %vm274_vm1, %v269_v15, %v271_v22  ;;  %v276_v28 = vsel %vm274_vm1, %v271_v22, %v269_v15 }
  0xa9   : > { %462 = vrot.lane.b32.xlu1 %v283_v25, %s975_s29  ;;  %v451_v29 = vmul.f32 %v447_v17, %v283_v25  ;;  %460 = vrot.lane.b32.xlu0 %v282_v26, %s975_s29  ;;  %v450_v30 = vmul.f32 %v443_v18, %v282_v26  ;;  %v321_v31 = vmul.f32 %v317_v19, %v275_v27  ;;  %v916_v19 = vld [vmem:[%s1251_s5 + $0x4] sm:$0x3] }
  0xaa   : > { %v320_v33 = vmul.f32 %v313_v20, %v276_v28  ;;  %v296_v17 = vrot.slane %v291_v7, %v1043_v10  ;;  %v300_v18 = vrot.slane %v291_v7, %v1045_v11 }
  0xab   : > { %v455_v34 = vrot.slane %v451_v29, 4  ;;  %v454_v35 = vrot.slane %v450_v30, 4  ;;  %v325_v36 = vrot.slane %v321_v31, 4  ;;  %v388_v37 = vpop.permute.xlu1 %387  ;;  %v386_v38 = vpop.permute.xlu0 %385 }
  0xac   : > { %v324_v39 = vrot.slane %v320_v33, 4  ;;  %v389_v40 = vsel %vm334_vm2, %v386_v38, %v388_v37  ;;  %v390_v41 = vsel %vm334_vm2, %v388_v37, %v386_v38 }
  0xad   : > { %459 = vst [vmem:[#allocation2 + $0x20] sm:$0xf0] %v455_v34  ;;  %458 = vst [vmem:[#allocation2 + $0x8] sm:$0xf0] %v454_v35  ;;  %416 = vrot.lane.b32.xlu1 %v283_v25, %s976_s30  ;;  %414 = vrot.lane.b32.xlu0 %v282_v26, %s976_s30  ;;  %v404_v43 = vmul.f32 %v397_v23, %v389_v40  ;;  %v405_v44 = vmul.f32 %v401_v24, %v390_v41 }
  0xae   : > { %329 = vst [vmem:[#allocation2] sm:$0xf0] %v325_v36  ;;  %328 = vst [vmem:[#allocation2 + $0x30] sm:$0xf0] %v324_v39  ;;  %v343_v26 = vrot.slane %v916_v19, %v1043_v10 }
  0xaf   : > { %v408_v46 = vrot.slane %v404_v43, 4  ;;  %v409_v47 = vrot.slane %v405_v44, 4  ;;  %v357_v48 = vpop.permute.xlu1 %356  ;;  %v355_v49 = vpop.permute.xlu0 %354 }
  0xb0   : > { %v358_v50 = vsel %vm288_vm3, %v355_v49, %v357_v48  ;;  %v359_v51 = vsel %vm288_vm3, %v357_v48, %v355_v49 }
  0xb1   : > { %286 = vrot.lane.b32.xlu1 %v275_v27, %s976_s30  ;;  %284 = vrot.lane.b32.xlu0 %v276_v28, %s976_s30  ;;  %412 = vst [vmem:[#allocation2 + $0x48] sm:$0xf0] %v408_v46  ;;  %413 = vst [vmem:[#allocation2 + $0x28] sm:$0xf0] %v409_v47  ;;  %v373_v52 = vmul.f32 %v366_v42, %v359_v51  ;;  %v374_v53 = vmul.f32 %v370_v45, %v358_v50  ;;  %v253_v51 = vld [vmem:[%s1247_s1] sm:$0x3] }
  0xb3   : > { %v377_v54 = vrot.slane %v373_v52, 4  ;;  %v378_v55 = vrot.slane %v374_v53, 4 }
  0xb5   : > { %332 = vrot.lane.b32.xlu1 %v275_v27, %s975_s29  ;;  %330 = vrot.lane.b32.xlu0 %v276_v28, %s975_s29  ;;  %381 = vst [vmem:[#allocation2 + $0x18] sm:$0xf0] %v377_v54  ;;  %382 = vst [vmem:[#allocation2 + $0x10] sm:$0xf0] %v378_v55  ;;  %v347_v27 = vrot.slane %v916_v19, %v1045_v11 }
  0xb8   : > { %v488_v39 = vld [vmem:[#allocation2 + $0x28] sm:$0xff] }
  0xb9   : > { %501 = vperm.xlu0 %952, %v255_v57   ;;  %v487_v41 = vld [vmem:[#allocation2 + $0x48] sm:$0xff] }
 0x11b   : > { %v463_v62 = vpop.permute.xlu1 %462  ;;  %v461_v63 = vpop.permute.xlu0 %460 }
 0x11c   : > { %v464_v1 = vsel %vm334_vm2, %v461_v63, %v463_v62  ;;  %v465_v2 = vsel %vm334_vm2, %v463_v62, %v461_v63 }
 0x11d   : > { %v479_v3 = vmul.f32 %v472_v59, %v464_v1  ;;  %v480_v4 = vmul.f32 %v476_v60, %v465_v2 }
 0x11f   : > { %481 = vst [vmem:[#allocation2 + $0x40] sm:$0xf] %v479_v3  ;;  %482 = vst [vmem:[#allocation2 + $0x38] sm:$0xf] %v480_v4  ;;  %v417_v8 = vpop.permute.xlu1 %416  ;;  %v415_v12 = vpop.permute.xlu0 %414 }
 0x120   : > { %v418_v13 = vsel %vm288_vm3, %v415_v12, %v417_v8  ;;  %v419_v14 = vsel %vm288_vm3, %v417_v8, %v415_v12 }
 0x121   : > { %v433_v15 = vmul.f32 %v426_v5, %v419_v14  ;;  %v434_v16 = vmul.f32 %v430_v6, %v418_v13  ;;  %v931_v6 = vld [vmem:[%s1251_s5 + $0xe] sm:$0x3]  ;;  %v926_v13 = vld [vmem:[%s1251_s5 + $0x2] sm:$0x3] }
 0x122   : > { %v737_v8 = vrot.slane %v931_v6, %v1045_v11  ;;  %v733_v12 = vrot.slane %v931_v6, %v1043_v10 }
 0x123   : > { %435 = vst [vmem:[#allocation2 + $0x8] sm:$0xf] %v433_v15  ;;  %436 = vst [vmem:[#allocation2 + $0x20] sm:$0xf] %v434_v16  ;;  %v287_v20 = vpop.permute.xlu1 %286  ;;  %v285_v21 = vpop.permute.xlu0 %284 }
 0x124   : > { %v289_v22 = vsel %vm288_vm3, %v285_v21, %v287_v20  ;;  %v290_v23 = vsel %vm288_vm3, %v287_v20, %v285_v21  ;;  %v929_v21 = vld [vmem:[%s1251_s5 + $0xa] sm:$0x3] }
 0x125   : > { %v303_v24 = vmul.f32 %v296_v17, %v290_v23  ;;  %v304_v25 = vmul.f32 %v300_v18, %v289_v22  ;;  %v609_v18 = vrot.slane %v926_v13, %v1043_v10  ;;  %v613_v22 = vrot.slane %v926_v13, %v1045_v11 }
 0x126   : > { %v492_v28 = vld [vmem:[#allocation2 + $0x38] sm:$0xf]  ;;  %v491_v29 = vld [vmem:[#allocation2 + $0x40] sm:$0xf] }
 0x127   : > { %305 = vst [vmem:[#allocation2 + $0x30] sm:$0xf] %v303_v24  ;;  %306 = vst [vmem:[#allocation2] sm:$0xf] %v304_v25  ;;  %v333_v30 = vpop.permute.xlu1 %332  ;;  %v331_v31 = vpop.permute.xlu0 %330  ;;  %v498_v32 = vpack.c.bf16 %v492_v28, %v492_v28  ;;  %v497_v33 = vpack.c.bf16 %v491_v29, %v491_v29 }
 0x128   : > { %v335_v34 = vsel %vm334_vm2, %v331_v31, %v333_v30  ;;  %v336_v35 = vsel %vm334_vm2, %v333_v30, %v331_v31  ;;  %v693_v30 = vrot.slane %v929_v21, %v1045_v11 }
 0x129   : > { %v350_v36 = vmul.f32 %v343_v26, %v335_v34  ;;  %v351_v37 = vmul.f32 %v347_v27, %v336_v35  ;;  %922 = vmatprep.subr.msk.bf16.mxu0 %vm508_vm4, %v498_v32  ;;  %v510_v38 = vsel %vm508_vm4, %v497_v33, 0  ;;  %v689_v26 = vrot.slane %v929_v21, %v1043_v10  ;;  %v928_v33 = vld [vmem:[%s1251_s5 + $0x6] sm:$0x3] }
 0x12a   : > { %526 = vmatpush1.bf16.msra.mxu0 %v510_v38  ;;  %v490_v40 = vld [vmem:[#allocation2 + $0x20] sm:$0xff]  ;;  %v489_v42 = vld [vmem:[#allocation2 + $0x8] sm:$0xff] }
 0x12b   : > { %352 = vst [vmem:[#allocation2 + $0x18] sm:$0xf] %v350_v36  ;;  %353 = vst [vmem:[#allocation2 + $0x10] sm:$0xf] %v351_v37  ;;  %v496_v43 = vpack.c.bf16 %v490_v40, %v488_v39  ;;  %v495_v44 = vpack.c.bf16 %v489_v42, %v487_v41  ;;  %v659_v39 = vrot.slane %v928_v33, %v1043_v10 }
 0x12c   : > { %v663_v42 = vrot.slane %v928_v33, %v1045_v11 }
 0x12d   : > { %527 = vmatprep.subr.bf16.mxu0 %v496_v43 }
 0x12e   : > { %528 = vmatpush1.bf16.msra.mxu0 %v495_v44  ;;  %v484_v45 = vld [vmem:[#allocation2] sm:$0xff]  ;;  %v483_v47 = vld [vmem:[#allocation2 + $0x30] sm:$0xff] }
 0x132   : > { %v486_v46 = vld [vmem:[#allocation2 + $0x10] sm:$0xff]  ;;  %v485_v48 = vld [vmem:[#allocation2 + $0x18] sm:$0xff] }
 0x133   : > { %v494_v49 = vpack.c.bf16 %v486_v46, %v484_v45  ;;  %v493_v50 = vpack.c.bf16 %v485_v48, %v483_v47 }
 0x134   : > { %v502_v52 = vpop.permute.xlu0 %501 }
 0x135   : > { %529 = vmatprep.subr.bf16.mxu0 %v494_v49 }
 0x136   : > { %530 = vmatpush1.bf16.msra.mxu0 %v493_v50 }
 0x139   : > { %923 = vmatmul.mubr.msk.bf16.vlgmr.msra.gmra.mxu0 %vm504_vm5, %v253_v51  ;;  %v256_v51 = vld [vmem:[%s1250_s4] sm:$0xf] }
 0x1f9   : > { %v549_v53 = vpop.f32.mrf.mxu0 }
 0x1fa   : > { %v550_v54 = vadd.f32 %v549_v53, %v502_v52 }
 0x1fb   : > { %v551_v55 = vpop.f32.mrf.mxu0 }
 0x1fc   : > { %v924_v56 = vmul.f32 -1.442695, %v550_v54  ;;  %v552_v57 = vadd.f32 %v551_v55, %v502_v52 }
 0x1fd   : > { %v553_v58 = vpop.f32.mrf.mxu0 }
 0x1fe   : > { %957 = vpow2.f32 %v924_v56  ;;  %v925_v59 = vmul.f32 -1.442695, %v552_v57 }
 0x1ff   : > { %v554_v60 = vpop.f32.mrf.mxu0 }
 0x200   : > { %959 = vpow2.f32 %v925_v59 }
 0x20b   : > { %v958_v61 = vpop.eup %957 }
 0x20c   : > { %v562_v62 = vadd.f32 1.0, %v958_v61 }
 0x20d   : > { %v960_v63 = vpop.eup %959 }
 0x20e   : > { %961 = vrcp.f32 %v562_v62  ;;  %v563_v1 = vadd.f32 1.0, %v960_v63 }
 0x210   : > { %963 = vrcp.f32 %v563_v1 }
 0x21b   : > { %v962_v2 = vpop.eup %961 }
 0x21c   : > { %v568_v3 = vmul.f32 %v962_v2, %v550_v54  ;;  %v932_v54 = vld [vmem:[%s1251_s5 + $0x10] sm:$0x3] }
 0x21d   : > { %v964_v4 = vpop.eup %963  ;;  %v761_v55 = vrot.slane %v932_v54, %v1043_v10  ;;  %v765_v56 = vrot.slane %v932_v54, %v1045_v11 }
 0x21e   : > { %676 = vst [vmem:[#allocation2 + $0x48] sm:$0xf] %v568_v3  ;;  %v569_v5 = vmul.f32 %v964_v4, %v552_v57  ;;  %570 = vrot.lane.b32.xlu0 %v568_v3, %s974_s28  ;;  %576 = vrot.lane.b32.xlu1 %v568_v3, %s973_s27  ;;  %v930_v57 = vld [vmem:[%s1251_s5 + $0xc] sm:$0x3] }
 0x21f   : > { %v717_v1 = vrot.slane %v930_v57, %v1043_v10  ;;  %v721_v2 = vrot.slane %v930_v57, %v1045_v11 }
 0x220   : > { %677 = vst [vmem:[#allocation2 + $0x28] sm:$0xf] %v569_v5 }
 0x222   : > { %678 = vrot.lane.b32.xlu0 %v568_v3, %s975_s29  ;;  %578 = vrot.lane.b32.xlu1 %v569_v5, %s973_s27 }
 0x226   : > { %648 = vrot.lane.b32.xlu0 %v568_v3, %s976_s30  ;;  %572 = vrot.lane.b32.xlu1 %v569_v5, %s974_s28  ;;  %v588_v3 = vld [vmem:[%s1251_s5] sm:$0x3] }
 0x227   : > { %v593_v13 = vrot.slane %v588_v3, %v1043_v10 }
 0x22a   : > { %680 = vrot.lane.b32.xlu1 %v569_v5, %s975_s29 }
 0x22e   : > { %650 = vrot.lane.b32.xlu1 %v569_v5, %s976_s30 }
 0x290   : > { %v577_v7 = vpop.permute.xlu1 %576  ;;  %v571_v14 = vpop.permute.xlu0 %570 }
 0x294   : > { %v579_v15 = vpop.permute.xlu1 %578  ;;  %v679_v29 = vpop.permute.xlu0 %678 }
 0x295   : > { %v581_v16 = vsel %vm281_vm0, %v579_v15, %v577_v7  ;;  %v580_v17 = vsel %vm281_vm0, %v577_v7, %v579_v15  ;;  %v927_v15 = vld [vmem:[%s1251_s5 + $0x4] sm:$0x3] }
 0x296   : > { %752 = vrot.lane.b32.xlu1 %v581_v16, %s975_s29  ;;  %v741_v19 = vmul.f32 %v737_v8, %v581_v16  ;;  %750 = vrot.lane.b32.xlu0 %v580_v17, %s975_s29  ;;  %v740_v20 = vmul.f32 %v733_v12, %v580_v17 }
 0x298   : > { %v745_v23 = vrot.slane %v741_v19, 4  ;;  %v744_v24 = vrot.slane %v740_v20, 4  ;;  %v573_v25 = vpop.permute.xlu1 %572  ;;  %v649_v43 = vpop.permute.xlu0 %648 }
 0x299   : > { %v575_v27 = vsel %vm274_vm1, %v573_v25, %v571_v14  ;;  %v574_v28 = vsel %vm274_vm1, %v571_v14, %v573_v25  ;;  %v597_v14 = vrot.slane %v588_v3, %v1045_v11 }
 0x29a   : > { %749 = vst [vmem:[#allocation2 + $0x20] sm:$0xf0] %v745_v23  ;;  %748 = vst [vmem:[#allocation2 + $0x8] sm:$0xf0] %v744_v24  ;;  %708 = vrot.lane.b32.xlu1 %v581_v16, %s976_s30  ;;  %706 = vrot.lane.b32.xlu0 %v580_v17, %s976_s30  ;;  %v616_v31 = vmul.f32 %v609_v18, %v575_v27  ;;  %v617_v32 = vmul.f32 %v613_v22, %v574_v28 }
 0x29b   : > { %v637_v22 = vrot.slane %v927_v15, %v1043_v10  ;;  %v641_v23 = vrot.slane %v927_v15, %v1045_v11 }
 0x29c   : > { %v681_v34 = vpop.permute.xlu1 %680  ;;  %v620_v35 = vrot.slane %v616_v31, 4  ;;  %v621_v36 = vrot.slane %v617_v32, 4 }
 0x29d   : > { %v682_v37 = vsel %vm334_vm2, %v679_v29, %v681_v34  ;;  %v683_v38 = vsel %vm334_vm2, %v681_v34, %v679_v29 }
 0x29e   : > { %v696_v40 = vmul.f32 %v689_v26, %v682_v37  ;;  %v697_v41 = vmul.f32 %v693_v30, %v683_v38  ;;  %582 = vrot.lane.b32.xlu0 %v575_v27, %s976_s30  ;;  %624 = vst [vmem:[#allocation2 + $0x30] sm:$0xf0] %v620_v35  ;;  %584 = vrot.lane.b32.xlu1 %v574_v28, %s976_s30  ;;  %625 = vst [vmem:[#allocation2] sm:$0xf0] %v621_v36 }
 0x2a0   : > { %v700_v44 = vrot.slane %v696_v40, 4  ;;  %v701_v45 = vrot.slane %v697_v41, 4  ;;  %v651_v46 = vpop.permute.xlu1 %650 }
 0x2a1   : > { %v652_v47 = vsel %vm288_vm3, %v649_v43, %v651_v46  ;;  %v653_v48 = vsel %vm288_vm3, %v651_v46, %v649_v43 }
 0x2a2   : > { %704 = vst [vmem:[#allocation2 + $0x48] sm:$0xf0] %v700_v44  ;;  %705 = vst [vmem:[#allocation2 + $0x28] sm:$0xf0] %v701_v45  ;;  %v666_v49 = vmul.f32 %v659_v39, %v653_v48  ;;  %v667_v50 = vmul.f32 %v663_v42, %v652_v47  ;;  %626 = vrot.lane.b32.xlu0 %v575_v27, %s975_s29  ;;  %628 = vrot.lane.b32.xlu1 %v574_v28, %s975_s29  ;;  %v254_v44 = vld [vmem:[%s1249_s3] sm:$0x3] }
 0x2a4   : > { %v670_v52 = vrot.slane %v666_v49, 4  ;;  %v671_v53 = vrot.slane %v667_v50, 4 }
 0x2a6   : > { %674 = vst [vmem:[#allocation2 + $0x18] sm:$0xf0] %v670_v52  ;;  %675 = vst [vmem:[#allocation2 + $0x10] sm:$0xf0] %v671_v53  ;;  %790 = vperm.xlu0 %952, %v256_v51  }
 0x2a9   : > { %v777_v11 = vld [vmem:[#allocation2 + $0x28] sm:$0xff] }
 0x2aa   : > { %v776_v35 = vld [vmem:[#allocation2 + $0x48] sm:$0xff] }
 0x308   : > { %v751_v58 = vpop.permute.xlu0 %750  ;;  %v753_v59 = vpop.permute.xlu1 %752 }
 0x309   : > { %v754_v60 = vsel %vm334_vm2, %v751_v58, %v753_v59  ;;  %v755_v61 = vsel %vm334_vm2, %v753_v59, %v751_v58 }
 0x30a   : > { %v768_v62 = vmul.f32 %v761_v55, %v754_v60  ;;  %v769_v63 = vmul.f32 %v765_v56, %v755_v61 }
 0x30c   : > { %770 = vst [vmem:[#allocation2 + $0x40] sm:$0xf] %v768_v62  ;;  %771 = vst [vmem:[#allocation2 + $0x38] sm:$0xf] %v769_v63  ;;  %v707_v4 = vpop.permute.xlu0 %706  ;;  %v709_v5 = vpop.permute.xlu1 %708 }
 0x30d   : > { %v710_v6 = vsel %vm288_vm3, %v707_v4, %v709_v5  ;;  %v711_v7 = vsel %vm288_vm3, %v709_v5, %v707_v4 }
 0x30e   : > { %v724_v8 = vmul.f32 %v717_v1, %v711_v7  ;;  %v725_v12 = vmul.f32 %v721_v2, %v710_v6 }
 0x310   : > { %726 = vst [vmem:[#allocation2 + $0x8] sm:$0xf] %v724_v8  ;;  %727 = vst [vmem:[#allocation2 + $0x20] sm:$0xf] %v725_v12  ;;  %v583_v16 = vpop.permute.xlu0 %582  ;;  %v585_v17 = vpop.permute.xlu1 %584 }
 0x311   : > { %v586_v18 = vsel %vm288_vm3, %v583_v16, %v585_v17  ;;  %v587_v19 = vsel %vm288_vm3, %v585_v17, %v583_v16 }
 0x312   : > { %v600_v20 = vmul.f32 %v593_v13, %v587_v19  ;;  %v601_v21 = vmul.f32 %v597_v14, %v586_v18 }
 0x313   : > { %v781_v24 = vld [vmem:[#allocation2 + $0x38] sm:$0xf]  ;;  %v780_v25 = vld [vmem:[#allocation2 + $0x40] sm:$0xf] }
 0x314   : > { %602 = vst [vmem:[#allocation2 + $0x30] sm:$0xf] %v600_v20  ;;  %603 = vst [vmem:[#allocation2] sm:$0xf] %v601_v21  ;;  %v627_v26 = vpop.permute.xlu0 %626  ;;  %v629_v27 = vpop.permute.xlu1 %628  ;;  %v787_v28 = vpack.c.bf16 %v781_v24, %v781_v24  ;;  %v786_v29 = vpack.c.bf16 %v780_v25, %v780_v25 }
 0x315   : > { %v630_v30 = vsel %vm334_vm2, %v627_v26, %v629_v27  ;;  %v631_v31 = vsel %vm334_vm2, %v629_v27, %v627_v26 }
 0x316   : > { %v644_v32 = vmul.f32 %v637_v22, %v630_v30  ;;  %v645_v33 = vmul.f32 %v641_v23, %v631_v31  ;;  %933 = vmatprep.subr.msk.bf16.mxu1 %vm508_vm4, %v787_v28  ;;  %v797_v10 = vsel %vm508_vm4, %v786_v29, 0 }
 0x317   : > { %813 = vmatpush1.bf16.msra.mxu1 %v797_v10  ;;  %v779_v34 = vld [vmem:[#allocation2 + $0x20] sm:$0xff]  ;;  %v778_v36 = vld [vmem:[#allocation2 + $0x8] sm:$0xff] }
 0x318   : > { %646 = vst [vmem:[#allocation2 + $0x18] sm:$0xf] %v644_v32  ;;  %647 = vst [vmem:[#allocation2 + $0x10] sm:$0xf] %v645_v33  ;;  %v785_v37 = vpack.c.bf16 %v779_v34, %v777_v11  ;;  %v784_v38 = vpack.c.bf16 %v778_v36, %v776_v35 }
 0x31a   : > { %814 = vmatprep.subr.bf16.mxu1 %v785_v37 }
 0x31b   : > { %815 = vmatpush1.bf16.msra.mxu1 %v784_v38  ;;  %v773_v39 = vld [vmem:[#allocation2] sm:$0xff]  ;;  %v772_v40 = vld [vmem:[#allocation2 + $0x30] sm:$0xff] }
 0x31f   : > { %v775_v9 = vld [vmem:[#allocation2 + $0x10] sm:$0xff]  ;;  %v774_v41 = vld [vmem:[#allocation2 + $0x18] sm:$0xff] }
 0x320   : > { %v783_v42 = vpack.c.bf16 %v775_v9, %v773_v39  ;;  %v782_v43 = vpack.c.bf16 %v774_v41, %v772_v40 }
 0x321   : > { %v791_v46 = vpop.permute.xlu0 %790 }
 0x322   : > { %816 = vmatprep.subr.bf16.mxu1 %v783_v42 }
 0x323   : > { %817 = vmatpush1.bf16.msra.mxu1 %v782_v43 }
 0x326   : > { %934 = vmatmul.mubr.msk.bf16.vlgmr.msra.gmra.mxu1 %vm504_vm5, %v254_v44 }
 0x3e6   : > { %v836_v45 = vpop.f32.mrf.mxu1 }
 0x3e7   : > { %v837_v48 = vadd.f32 %v836_v45, %v791_v46 }
 0x3e8   : > { %v838_v47 = vpop.f32.mrf.mxu1 }
 0x3e9   : > { %v839_v49 = vadd.f32 %v838_v47, %v791_v46 }
 0x3ea   : > { %v840_v50 = vpop.f32.mrf.mxu1 }
 0x3eb   : > { %v846_v51 = vcombine.low %v837_v48, %v839_v49 }
 0x3ec   : > { %v841_v52 = vpop.f32.mrf.mxu1 }
 0x3ed   : > { %v848_v53 = vadd.f32 %v846_v51, %v1029_v0 }
 0x3ef   : > { %849 = vst [vmem:[%s251_s11] sm:$0xff] %v848_v53 }
 0x3f0 PF: > { %s16_s21 = sadd.s32 1, %s971_s21  }
 0x3f1   : > { %p13_p4 = scmp.ge.s32.totalorder %s16_s21, 4  }
 0x3f3   :  { %15 = sbr.rel (!%p13_p4) target bundleno = 1 (0x1), region = 81 }

</bundles_post_ra>
